<compile_context>
chip_gen: v5e
topology: v5e:2x2
jax: 0.10.0
libtpu: 0.0.40
codegen_flags: <defaults>
</compile_context>

<pallas_src>
import functools

import jax
import jax.numpy as jnp
from jax.experimental import pallas as pl
from jax.experimental.pallas import tpu as pltpu


# --------------------------------------------------------------------------- #
# Kernels
# --------------------------------------------------------------------------- #
def _grn_resident_kernel(x_ref, gamma_ref, beta_ref, o_ref, *, mean_div,
                         fold_shifts):
    """Single-pass per-batch kernel: whole (hwp, cp) slab resident in VMEM."""
    xf = x_ref[0].astype(jnp.float32)                         # (hwp, cp)
    sumsq = jnp.sum(xf * xf, axis=0, keepdims=True)           # (1, cp)
    # Fold packed lane groups so every lane holds its true channel's sum.
    for s in fold_shifts:                                     # static python loop
        sumsq = sumsq + pltpu.roll(sumsq, shift=s, axis=1)
    agg = jnp.sqrt(sumsq)                                     # L2 over spatial dims
    mean = jnp.sum(agg, axis=-1, keepdims=True) * (1.0 / mean_div)
    stand = agg / (mean + 1e-6)
    scale = gamma_ref[...] * stand + 1.0                      # gamma is f32 (1, cp)
    # out = gamma*(x*stand) + beta + x == x*(gamma*stand + 1) + beta, all in f32.
    o_ref[0] = (xf * scale + beta_ref[...]).astype(o_ref.dtype)


def _grn_stream_kernel(x_ref, gamma_ref, beta_ref, o_ref, acc_ref, scale_ref,
                       *, mean_div, fold_shifts):
    """Fused two-phase streaming kernel, grid = (B, 2, n_tiles)."""
    p = pl.program_id(1)
    t = pl.program_id(2)
    nt = pl.num_programs(2)

    @pl.when(p == 0)
    def _phase0():
        @pl.when(t == 0)
        def _():
            acc_ref[...] = jnp.zeros_like(acc_ref)

        xf = x_ref[0].astype(jnp.float32)                         # (tile, cp)
        acc_ref[...] += jnp.sum(xf * xf, axis=0, keepdims=True)   # (1, cp)

        @pl.when(t == nt - 1)
        def _():
            sumsq = acc_ref[...]
            for s in fold_shifts:                                 # static loop
                sumsq = sumsq + pltpu.roll(sumsq, shift=s, axis=1)
            agg = jnp.sqrt(sumsq)
            mean = jnp.sum(agg, axis=-1, keepdims=True) * (1.0 / mean_div)
            stand = agg / (mean + 1e-6)
            scale_ref[...] = gamma_ref[...] * stand + 1.0

    @pl.when(p == 1)
    def _phase1():
        xf = x_ref[0].astype(jnp.float32)                         # f32 FMA
        o_ref[0] = (xf * scale_ref[...] + beta_ref[...]).astype(o_ref.dtype)


# --------------------------------------------------------------------------- #
# Host-side helpers
# --------------------------------------------------------------------------- #
def _vmem_capacity_bytes():
    try:
        return int(pltpu.get_tpu_info().vmem_capacity_bytes)
    except Exception:
        return 64 * 1024 * 1024  # conservative (v7x per-TC)


def _pick_spatial_tile(n_rows, row_bytes, sub, target_block_bytes):
    """Largest divisor of n_rows that is a multiple of `sub` and <= byte target.

    Caller guarantees n_rows % sub == 0, so `sub` is always a valid answer
    (never falls back to a full-slab block).
    """
    if n_rows * row_bytes <= target_block_bytes:
        return n_rows
    max_rows = max(sub, (target_block_bytes // row_bytes) // sub * sub)
    best = sub
    t = sub
    while t <= max_rows:
        if n_rows % t == 0:
            best = t
        t += sub
    return best


def _x_stream_spec(tile, cp):
    """Streaming x BlockSpec; deeper pipelining if the API supports it."""
    index_map = lambda b, p, t: (b, t, 0)
    try:
        return pl.BlockSpec((1, tile, cp), index_map,
                            pipeline_mode=pl.Buffered(3))
    except TypeError:
        return pl.BlockSpec((1, tile, cp), index_map)


# --------------------------------------------------------------------------- #
# Public wrapper
# --------------------------------------------------------------------------- #
def global_response_norm(x, gamma, beta, *, force_streaming=False,
                         target_block_bytes=2 * 1024 * 1024):
    """x: (B, H, W, C) channels-last; gamma, beta: (1, 1, 1, C)."""
    B, H, W, C = x.shape
    HW = H * W
    dtype = x.dtype
    itemsize = jnp.dtype(dtype).itemsize
    # Sublane packing: 8 rows f32, 16 bf16, 32 int8/fp8.
    sub = max(8, 32 // itemsize)

    gamma2 = gamma.reshape(1, C).astype(jnp.float32)
    beta2 = beta.reshape(1, C).astype(jnp.float32)
    x2 = x.reshape(B, HW, C)

    # --- lane packing / padding so the last dim is a multiple of 128 -------- #
    if C % 128 == 0:
        groups, cp = 1, C
        gamma_p, beta_p = gamma2, beta2
        mean_div = float(cp)
        fold_shifts = ()
    elif 128 % C == 0:
        groups = 128 // C
        cp = 128
        gamma_p = jnp.tile(gamma2, (1, groups))
        beta_p = jnp.tile(beta2, (1, groups))
        mean_div = float(cp)           # channels replicated `groups` times
        shifts, s = [], cp // 2
        while s >= C:
            shifts.append(s)
            s //= 2
        fold_shifts = tuple(shifts)
    else:
        # Zero-pad channels to the next multiple of 128 (lane-dense stores).
        groups = 1
        cp = -(-C // 128) * 128
        pad_c = cp - C
        x2 = jnp.pad(x2, ((0, 0), (0, 0), (0, pad_c)))
        gamma_p = jnp.pad(gamma2, ((0, 0), (0, pad_c)))
        beta_p = jnp.pad(beta2, ((0, 0), (0, pad_c)))
        mean_div = float(C)            # padded lanes contribute 0 to the sum
        fold_shifts = ()

    # --- spatial padding so the packed row count is a multiple of `sub` ----- #
    row_multiple = groups * sub
    HW_pad = -(-HW // row_multiple) * row_multiple
    if HW_pad != HW:
        x2 = jnp.pad(x2, ((0, 0), (0, HW_pad - HW), (0, 0)))
    hwp = HW_pad // groups
    x3 = x2.reshape(B, hwp, cp)        # lane-dense, same bytes (no pad case)

    vmem_cap = _vmem_capacity_bytes()
    slab_bytes = hwp * cp * itemsize
    slab_f32 = hwp * cp * 4
    # 2 in bufs + 2 out bufs + f32 temporaries headroom + misc.
    resident_need = 4 * slab_bytes + 3 * slab_f32 + (1 << 20)
    use_resident = (not force_streaming) and resident_need <= int(0.55 * vmem_cap)

    if use_resident:
        # ---------------- single pass, slab resident in VMEM --------------- #
        vmem_limit = min(vmem_cap - (2 << 20),
                         max(resident_need + (4 << 20), 32 << 20))
        out3 = pl.pallas_call(
            functools.partial(_grn_resident_kernel, mean_div=mean_div,
                              fold_shifts=fold_shifts),
            out_shape=jax.ShapeDtypeStruct((B, hwp, cp), dtype),
            grid_spec=pltpu.PrefetchScalarGridSpec(
                num_scalar_prefetch=0,
                grid=(B,),
                in_specs=[
                    pl.BlockSpec((1, hwp, cp), lambda b: (b, 0, 0)),
                    pl.BlockSpec((1, cp), lambda b: (0, 0)),
                    pl.BlockSpec((1, cp), lambda b: (0, 0)),
                ],
                out_specs=pl.BlockSpec((1, hwp, cp), lambda b: (b, 0, 0)),
            ),
            compiler_params=pltpu.CompilerParams(
                dimension_semantics=("parallel",),
                vmem_limit_bytes=int(vmem_limit)),
        )(x3, gamma_p, beta_p)
    else:
        # ------------- fused two-phase streaming over spatial tiles -------- #
        row_bytes = cp * itemsize
        tile = _pick_spatial_tile(hwp, row_bytes, sub, target_block_bytes)
        n_tiles = hwp // tile
        block_bytes = tile * cp * itemsize
        stream_need = 5 * block_bytes + 3 * tile * cp * 4 + (2 << 20)
        vmem_limit = min(vmem_cap - (2 << 20), max(stream_need, 24 << 20))

        # Output block index: phase 0 parks on block 0 (never flushed with
        # garbage because phase 1 / t == 0 rewrites it before the first flush);
        # phase 1 walks the real tiles -> exactly one HBM write per tile.
        out_spec = pl.BlockSpec((1, tile, cp), lambda b, p, t: (b, t * p, 0))

        out3 = pl.pallas_call(
            functools.partial(_grn_stream_kernel, mean_div=mean_div,
                              fold_shifts=fold_shifts),
            out_shape=jax.ShapeDtypeStruct((B, hwp, cp), dtype),
            grid_spec=pltpu.PrefetchScalarGridSpec(
                num_scalar_prefetch=0,
                grid=(B, 2, n_tiles),
                in_specs=[
                    _x_stream_spec(tile, cp),
                    pl.BlockSpec((1, cp), lambda b, p, t: (0, 0)),
                    pl.BlockSpec((1, cp), lambda b, p, t: (0, 0)),
                ],
                out_specs=out_spec,
                scratch_shapes=[pltpu.VMEM((1, cp), jnp.float32),   # sum(x^2)
                                pltpu.VMEM((1, cp), jnp.float32)],  # scale
            ),
            compiler_params=pltpu.CompilerParams(
                dimension_semantics=("parallel", "arbitrary", "arbitrary"),
                vmem_limit_bytes=int(vmem_limit)),
        )(x3, gamma_p, beta_p)

    # --- unpack / unpad ------------------------------------------------------ #
    if groups > 1:
        out2 = out3.reshape(B, HW_pad, C)
    else:
        out2 = out3
        if cp != C:
            out2 = out2[:, :, :C]
    if HW_pad != HW:
        out2 = out2[:, :HW, :]
    return out2.reshape(B, H, W, C)


# --------------------------------------------------------------------------- #
# Reference & test
# --------------------------------------------------------------------------- #
def _reference(x, gamma, beta):
    # Pure-JAX reference mirroring the PyTorch forward exactly.
    agg_norm = jnp.sqrt(jnp.sum(x.astype(jnp.float32) ** 2,
                                axis=(1, 2), keepdims=True))      # (B,1,1,C)
    stand = agg_norm / (jnp.mean(agg_norm, axis=-1, keepdims=True) + 1e-6)
    return (gamma * (x * stand) + beta + x).astype(x.dtype)


if __name__ == "__main__":
    key = jax.random.PRNGKey(0)
    kx, kg, kb = jax.random.split(key, 3)

    B, H, W, C = 2, 16, 16, 32
    x = jax.random.normal(kx, (B, H, W, C), dtype=jnp.float32)
    # Module __init__ uses zeros; deterministic random values exercise the
    # full compute path (shapes match the nn.Parameter shapes).
    gamma = 0.1 * jax.random.normal(kg, (1, 1, 1, C), dtype=jnp.float32)
    beta = 0.1 * jax.random.normal(kb, (1, 1, 1, C), dtype=jnp.float32)

    ref = _reference(x, gamma, beta)

    # Fast path: VMEM-resident single-pass kernel (reads x from HBM once).
    out = global_response_norm(x, gamma, beta)
    out = jax.block_until_ready(out)
    assert out.shape == x.shape and out.dtype == x.dtype
    assert jnp.allclose(out, ref, atol=1e-5, rtol=1e-5), "resident path mismatch"

    # Also exercise the fused multi-tile streaming path (tiny block target
    # forces n_tiles > 1).
    out_s = global_response_norm(x, gamma, beta, force_streaming=True,
                                 target_block_bytes=8 * 1024)
    out_s = jax.block_until_ready(out_s)
    assert jnp.allclose(out_s, ref, atol=1e-5, rtol=1e-5), "stream path mismatch"

    print("KERNEL_OK")
</pallas_src>

<mosaic_0001>
module attributes {stable_mosaic.version = 11 : i64} {
  func.func @_grn_resident_kernel(%arg0: i32, %arg1: memref<1x64x128xf32, #tpu.memory_space<vmem>>, %arg2: memref<1x128xf32, #tpu.memory_space<vmem>>, %arg3: memref<1x128xf32, #tpu.memory_space<vmem>>, %arg4: memref<1x64x128xf32, #tpu.memory_space<vmem>>) attributes {dimension_semantics = [#tpu.dimension_semantics<parallel>], iteration_bounds = array<i64: 2>, scalar_prefetch = 0 : i64, scratch_operands = 0 : i64, tpu.core_type = #tpu.core_type<tc>, window_params = [{transform_indices = @transform_0, window_bounds = array<i64: 1, 64, 128>}, {pipeline_mode = #tpu.pipeline_mode<synchronous>, transform_indices = @transform_1, window_bounds = array<i64: 1, 128>}, {pipeline_mode = #tpu.pipeline_mode<synchronous>, transform_indices = @transform_2, window_bounds = array<i64: 1, 128>}, {transform_indices = @transform_3, window_bounds = array<i64: 1, 64, 128>}]} {
    %c0 = arith.constant 0 : index
    %c0_0 = arith.constant 0 : index
    %c0_1 = arith.constant 0 : index
    %0 = vector.load %arg1[%c0, %c0_0, %c0_1] : memref<1x64x128xf32, #tpu.memory_space<vmem>>, vector<1x64x128xf32>
    %1 = vector.shape_cast %0 : vector<1x64x128xf32> to vector<64x128xf32>
    %2 = arith.mulf %1, %1 : vector<64x128xf32>
    %cst = arith.constant dense<0.000000e+00> : vector<128xf32>
    %3 = vector.multi_reduction <add>, %2, %cst [0] : vector<64x128xf32> to vector<128xf32>
    %4 = vector.shape_cast %3 : vector<128xf32> to vector<1x128xf32>
    %c64_i32 = arith.constant 64 : i32
    %5 = tpu.dynamic_rotate %4 by %c64_i32 dim 1 : vector<1x128xf32>, i32 -> vector<1x128xf32>
    %6 = arith.addf %4, %5 : vector<1x128xf32>
    %c32_i32 = arith.constant 32 : i32
    %7 = tpu.dynamic_rotate %6 by %c32_i32 dim 1 : vector<1x128xf32>, i32 -> vector<1x128xf32>
    %8 = arith.addf %6, %7 : vector<1x128xf32>
    %9 = math.sqrt %8 : vector<1x128xf32>
    %cst_2 = arith.constant dense<0.000000e+00> : vector<1xf32>
    %10 = vector.multi_reduction <add>, %9, %cst_2 [1] : vector<1x128xf32> to vector<1xf32>
    %11 = vector.shape_cast %10 : vector<1xf32> to vector<1x1xf32>
    %cst_3 = arith.constant 7.812500e-03 : f32
    %12 = vector.broadcast %cst_3 : f32 to vector<1x1xf32>
    %13 = arith.mulf %11, %12 : vector<1x1xf32>
    %cst_4 = arith.constant 9.99999997E-7 : f32
    %14 = vector.broadcast %cst_4 : f32 to vector<1x1xf32>
    %15 = arith.addf %13, %14 : vector<1x1xf32>
    %16 = vector.broadcast %15 : vector<1x1xf32> to vector<1x128xf32>
    %17 = arith.divf %9, %16 : vector<1x128xf32>
    %c0_5 = arith.constant 0 : index
    %c0_6 = arith.constant 0 : index
    %18 = vector.load %arg2[%c0_5, %c0_6] : memref<1x128xf32, #tpu.memory_space<vmem>>, vector<1x128xf32>
    %19 = arith.mulf %18, %17 : vector<1x128xf32>
    %cst_7 = arith.constant 1.000000e+00 : f32
    %20 = vector.broadcast %cst_7 : f32 to vector<1x128xf32>
    %21 = arith.addf %19, %20 : vector<1x128xf32>
    %22 = vector.broadcast %21 : vector<1x128xf32> to vector<64x128xf32>
    %23 = arith.mulf %1, %22 : vector<64x128xf32>
    %c0_8 = arith.constant 0 : index
    %c0_9 = arith.constant 0 : index
    %24 = vector.load %arg3[%c0_8, %c0_9] : memref<1x128xf32, #tpu.memory_space<vmem>>, vector<1x128xf32>
    %25 = vector.broadcast %24 : vector<1x128xf32> to vector<64x128xf32>
    %26 = arith.addf %23, %25 : vector<64x128xf32>
    %c0_10 = arith.constant 0 : index
    %c0_11 = arith.constant 0 : index
    %c0_12 = arith.constant 0 : index
    %27 = vector.load %arg4[%c0_10, %c0_11, %c0_12] : memref<1x64x128xf32, #tpu.memory_space<vmem>>, vector<1x64x128xf32>
    %28 = vector.shape_cast %27 : vector<1x64x128xf32> to vector<64x128xf32>
    %29 = vector.shape_cast %26 : vector<64x128xf32> to vector<1x64x128xf32>
    tpu.vector_store %arg4[%c0_10, %c0_11, %c0_12], %29 {strides = array<i32>} : memref<1x64x128xf32, #tpu.memory_space<vmem>>, vector<1x64x128xf32>,
    return
  }
  func.func @transform_0(%arg0: i32) -> (i32, i32, i32) {
    %c0_i32 = arith.constant 0 : i32
    %c0_i32_0 = arith.constant 0 : i32
    %c0_i32_1 = arith.constant 0 : i32
    return %arg0, %c0_i32, %c0_i32_0 : i32, i32, i32
  }
  func.func @transform_1(%arg0: i32) -> (i32, i32) {
    %c0_i32 = arith.constant 0 : i32
    %c0_i32_0 = arith.constant 0 : i32
    %c0_i32_1 = arith.constant 0 : i32
    return %c0_i32, %c0_i32_0 : i32, i32
  }
  func.func @transform_2(%arg0: i32) -> (i32, i32) {
    %c0_i32 = arith.constant 0 : i32
    %c0_i32_0 = arith.constant 0 : i32
    %c0_i32_1 = arith.constant 0 : i32
    return %c0_i32, %c0_i32_0 : i32, i32
  }
  func.func @transform_3(%arg0: i32) -> (i32, i32, i32) {
    %c0_i32 = arith.constant 0 : i32
    %c0_i32_0 = arith.constant 0 : i32
    %c0_i32_1 = arith.constant 0 : i32
    return %arg0, %c0_i32, %c0_i32_0 : i32, i32, i32
  }
}

</mosaic_0001>

<bundles_post_ra>
// kernel: tpu_custom_call.1
= control target key start
LH: loop header
LB: loop body
LE: loop exit
PB: predicated region body
PF: predicated region fallthrough
CT: control target
= control target key end

     0   :  { %8 = vsyncpa [#allocation3], 0  ;;  %s841_s0 = inlined_call_operand.hbm [shape: f32[2,64,128], index: 0, kind: input, shape index: {}]   ;;  %s842_s1 = inlined_call_operand.hbm [shape: f32[1,128], index: 1, kind: input, shape index: {}]   ;;  %s843_s2 = inlined_call_operand.vmem [shape: f32[1,128], index: 2, kind: input, shape index: {}]   ;;  %s844_s3 = inlined_call_operand.hbm [shape: f32[2,64,128], index: 3, kind: output, shape index: {}]  }
   0x1   :  { %10 = vsyncpa [#allocation3 + $0x1], 0 }
   0x2   :  { %11 = vsyncpa [#allocation6], 0 }
   0x3   :  { %12 = vsyncpa [#allocation4], 0 }
   0x4   :  { %14 = vsyncpa [#allocation4 + $0x1], 0  ;;  %s652_s12 = smov 0   ;;  %s654_s13 = smov 0  }
   0x5   :  { %s656_s14 = smov 0   ;;  %s658_s15 = smov 0  }
   0x6 LB: > { %s673_s16 = sadd.s32 4294967295, %s623_s15   ;;  %s407_s17 = sadd.s32 4294967294, %s623_s15   ;;  %s623_s15 = sphi %s658_s15, %s855_s15   ;;  %s619_s14 = sphi %s656_s14, %s854_s14   ;;  %s615_s13 = sphi %s654_s13, %s853_s13   ;;  %s611_s12 = sphi %s652_s12, %s852_s12  }
   0x7   : > { %s677_s18 = sadd.s32 1, %s623_s15   ;;  %s27_s19 = sadd.s32 1, %s619_s14 }
   0x8   : > { %s24_s20 = ssub.s32 %s623_s15, %s677_s18  ;;  %p34_p0 = scmp.ne.s32.totalorder %s619_s14, %s615_s13 }
   0x9   : > { %p25_p1 = scmp.eq.s32.totalorder %s24_s20, 0  ;;  %p35_p2 = scmp.eq.s32.totalorder %s623_s15, 0 }
   0xa   : > { %p40_p3 = scmp.ne.s32.totalorder %s615_s13, %s611_s12  ;;  %p41_p4 = scmp.eq.s32.totalorder %s673_s16, 0 }
   0xb   : > { %s689_s21 = scalar_select %p25_p1, %s619_s14, %s27_s19  }
   0xc   : > { %p691_p5 = por %p35_p2, %p34_p0  ;;  %p697_p6 = por %p41_p4, %p40_p3 }
   0xd   : > { %p106_p7 = scmp.eq.s32.totalorder %s673_s16, 1  ;;  %p112_p8 = scmp.eq.s32.totalorder %s407_s17, 1 }
   0xe   : > { %p408_p9 = scmp.ge.s32.totalorder %s623_s15, 1  ;;  %p119_p10 = scmp.lt.s32.totalorder %s623_s15, 3 }
   0xf   : > { %p704_p11 = por %p106_p7, %p34_p0  ;;  %p708_p12 = por %p112_p8, %p40_p3 }
  0x10   : > { %p712_p13 = pnand %p408_p9, %p119_p10  ;;  %s131_s29 = sshll.u32 %s842_s1, 4  ;;  %s132_s29 = int_to_ptr.hbm [resolvable:$true] %s131_s29 }
  0x11   : > { %s625_s30 = smov [#allocation5]   ;;  %p446_p3 = scmp.lt.s32.totalorder %s623_s15, 2 }
  0x12   : > { %p433_p1 = pneg %p712_p13  ;;  %s133_s4 = sshll.u32 %s625_s30, 4  ;;  %s134_s4 = int_to_ptr.vmem [resolvable:$true] %s133_s4 }
  0x13   : > { %s147_s5 = sand.u32 1, %s619_s14   ;;  %p728_p7 = pnand %p446_p3, %p691_p5 }
  0x14   : > { %p434_p2 = pnand %p433_p1, %p41_p4  ;;  %s411_s7 = sshll.u32 %s147_s5, 6 }
  0x15   : > { %s423_s8 = sshll.u32 %s623_s15, 6  ;;  %s151_s19 = scalar_lea.vmem [#allocation2], %s411_s7 }
  0x16   : > { %436 = dma.hbm_to_vmem [thread:$0]  (!%p434_p2), %s132_s29, 16, %s134_s4, [#allocation6]  }
  0x17   : > { %s156_s11 = scalar_lea.hbm %s841_s0, %s423_s8  ;;  %s159_s20 = sshll.u32 %s151_s19, 4  ;;  %s160_s20 = int_to_ptr.vmem [resolvable:$true] %s159_s20 }
  0x18   : > { %s157_s17 = sshll.u32 %s156_s11, 4  ;;  %s148_s27 = scalar_lea.sflag [#allocation3], %s147_s5  ;;  %s158_s17 = int_to_ptr.hbm [resolvable:$true] %s157_s17 }
  0x19   : > { %s523_s28 = sshra.s32 %s158_s17, 4  ;;  %p527_p8 = pneg %p728_p7  ;;  %s524_s28 = int_to_ptr.hbm [resolvable:$true] %s523_s28 }
  0x1a   : > { %s525_s22 = scalar_lea.hbm %s524_s28, 64  ;;  %s530_s4 = scalar_lea.hbm %s841_s0, 128 }
  0x1b   : > { %p526_p5 = scmp.ne.s32.totalorder %s524_s28, %s525_s22  ;;  %p531_p1 = scmp.lt.s32.totalorder %s524_s28, %s841_s0 }
  0x1c   : > { %p532_p2 = scmp.lt.s32.totalorder %s530_s4, %s525_s22 }
  0x1d   : > { %p528_p9 = pnand %p527_p8, %p526_p5 }
  0x1e   : > { %p533_p3 = por %p532_p2, %p531_p1 }
  0x1f   : > { %p529_p10 = pneg %p528_p9 }
  0x21   : > { %p534_p0 = pnand %p533_p3, %p529_p10 }
  0x23   : > { %537 = shalt.err (!%p534_p0)
}
  0x24   : > { %s626_s5 = smov 128   ;;  %s627_s7 = smov 8  }
  0x25   : > { %440 = dma.hbm_to_vmem [thread:$0]  (!%p728_p7), %s158_s17, 1024, %s160_s20, %s148_s27, %s626_s5, %s626_s5, %s627_s7  }
  0x26   : > { %171 = sbr.rel (%p712_p13) target bundleno = 491 (0x1eb), region = 32  ;;  %s749_s10 = sand.u32 (!%p712_p13), 1, %s615_s13  }
  0x27   : > { %s415_s11 = sshll.u32 (!%p712_p13), %s749_s10, 6  ;;  %s174_s19 = scalar_lea.sflag (!%p712_p13), [#allocation3], %s749_s10 }
  0x28   : > { %s177_s28 = scalar_lea.vmem (!%p712_p13), [#allocation2], %s415_s11 }
  0x2b   : > { %598 = dma.done.wait (%p697_p6), %s174_s19, 1024  }
  0x2c   : > { %600 = vsyncadd (%p697_p6), %s174_s19, 4294966272 }
  0x2d   : > { %602 = dma.done.wait (%p41_p4), [#allocation6], 16  }
  0x2e   : > { %604 = vsyncadd (%p41_p4), [#allocation6], 4294967280  ;;  %v763_v0 = vld [vmem:[%s177_s28] sm:$0xff]  ;;  %v765_v1 = vld [vmem:[%s177_s28 + $0x8] sm:$0xff]  ;;  %s628_s23 = smov 64   ;;  %s629_s26 = smov 32  }
  0x2f   : > { %v767_v2 = vld [vmem:[%s177_s28 + $0x10] sm:$0xff]  ;;  %v769_v3 = vld [vmem:[%s177_s28 + $0x18] sm:$0xff]  ;;  %v214_v4 = vmul.f32 %v763_v0, %v763_v0  ;;  %v215_v5 = vmul.f32 %v765_v1, %v765_v1  ;;  %v777_v7 = vld [vmem:[%s177_s28 + $0x20] sm:$0xff]  ;;  %vm253_vm1 = vcmask 1040384   ;;  %s424_s20 = sshll.u32 %s673_s16, 6  ;;  %s205_s29 = scalar_lea.vmem [#allocation7], %s415_s11 }
  0x30   : > { %v216_v6 = vmul.f32 %v767_v2, %v767_v2  ;;  %v217_v8 = vmul.f32 %v769_v3, %v769_v3  ;;  %v781_v10 = vld [vmem:[%s177_s28 + $0x28] sm:$0xff]  ;;  %v218_v11 = vmul.f32 %v777_v7, %v777_v7  ;;  %v785_v13 = vld [vmem:[%s177_s28 + $0x30] sm:$0xff]  ;;  %v789_v16 = vld [vmem:[%s177_s28 + $0x38] sm:$0xff]  ;;  %s320_s16 = scalar_lea.hbm %s844_s3, %s424_s20  ;;  %s321_s30 = sshll.u32 %s205_s29, 4  ;;  %s322_s30 = int_to_ptr.vmem [resolvable:$true] %s321_s30 }
  0x31   : > { %v222_v9 = vadd.f32 %v215_v5, %v214_v4  ;;  %v219_v14 = vmul.f32 %v781_v10, %v781_v10  ;;  %v220_v17 = vmul.f32 %v785_v13, %v785_v13  ;;  %v221_v19 = vmul.f32 %v789_v16, %v789_v16  ;;  %v274_v56 = vld [vmem:[#allocation5] sm:$0x1]  ;;  %s323_s4 = sshll.u32 %s320_s16, 4  ;;  %s309_s9 = scalar_lea.sflag [#allocation4], %s749_s10  ;;  %s324_s4 = int_to_ptr.hbm [resolvable:$true] %s323_s4 }
  0x32   : > { %v488_v62 = vld [vmem:[%s843_s2] ss:$0 sm:$0xff]  ;;  %s567_s8 = sshra.s32 %s324_s4, 4  ;;  %s573_s19 = scalar_lea.hbm %s844_s3, 128  ;;  %s568_s8 = int_to_ptr.hbm [resolvable:$true] %s567_s8 }
  0x33   : > { %v223_v12 = vadd.f32 %v222_v9, %v216_v6  ;;  %s569_s5 = scalar_lea.hbm %s568_s8, 64  ;;  %p574_p0 = scmp.lt.s32.totalorder %s568_s8, %s844_s3 }
  0x34   : > { %p570_p4 = scmp.ne.s32.totalorder %s568_s8, %s569_s5  ;;  %p575_p7 = scmp.lt.s32.totalorder %s573_s19, %s569_s5 }
  0x35   : > { %v224_v15 = vadd.f32 %v223_v12, %v217_v8 }
  0x36   : > { %p571_p6 = pnand %p570_p4, %p704_p11  ;;  %p576_p5 = por %p575_p7, %p574_p0 }
  0x37   : > { %v225_v18 = vadd.f32 %v224_v15, %v218_v11 }
  0x38   : > { %p572_p13 = pneg %p571_p6 }
  0x39   : > { %v226_v20 = vadd.f32 %v225_v18, %v219_v14 }
  0x3a   : > { %p577_p8 = pnand %p576_p5, %p572_p13 }
  0x3b   : > { %v227_v21 = vadd.f32 %v226_v20, %v220_v17 }
  0x3d   : > { %v228_v22 = vadd.f32 %v227_v21, %v221_v19 }
  0x3f   : > { %v229_v23 = vrot.slane %v228_v22, 4 }
  0x41   : > { %v230_v24 = vadd.f32 %v229_v23, %v228_v22 }
  0x43   : > { %v231_v25 = vrot.slane %v230_v24, 2 }
  0x45   : > { %v232_v26 = vadd.f32 %v231_v25, %v230_v24 }
  0x47   : > { %v233_v27 = vrot.slane %v232_v26, 1 }
  0x49   : > { %v234_v28 = vadd.f32 %v233_v27, %v232_v26 }
  0x4b   : > { %235 = vrot.lane.b32.xlu0 %v234_v28, %s628_s23 }
  0xbd   : > { %v236_v29 = vpop.permute.xlu0 %235 }
  0xbe   : > { %v237_v30 = vadd.f32 %v236_v29, %v234_v28 }
  0xc0   : > { %238 = vrot.lane.b32.xlu0 %v237_v30, %s629_s26 }
 0x132   : > { %v239_v31 = vpop.permute.xlu0 %238 }
 0x133   : > { %v240_v32 = vadd.f32 %v239_v31, %v237_v30 }
 0x135   : > { %489 = vrsqrt.f32 %v240_v32  ;;  %vm248_vm0 = vcmp.eq.f32.partialorder %v240_v32, inf  ;;  %v251_v40 = vand.u32 2147483648, %v240_v32  ;;  %vm250_vm2 = vcmp.eq.f32.partialorder %v240_v32, 0.0 }
 0x13b   : > { %v490_v33 = vpop.eup %489 }
 0x13c   : > { %v242_v34 = vmul.f32 %v490_v33, %v240_v32 }
 0x13e   : > { %v243_v35 = vmul.f32 %v490_v33, %v242_v34 }
 0x140   : > { %v244_v36 = vmul.f32 0.5, %v243_v35 }
 0x142   : > { %v245_v37 = vsub.f32 1.5, %v244_v36 }
 0x144   : > { %v246_v38 = vmul.f32 %v490_v33, %v245_v37 }
 0x146   : > { %v247_v39 = vmul.f32 %v246_v38, %v240_v32 }
 0x148   : > { %v249_v41 = vsel %vm248_vm0, %v240_v32, %v247_v39 }
 0x149   : > { %v252_v42 = vsel %vm250_vm2, %v251_v40, %v249_v41 }
 0x14a   : > { %v254_v43 = vsel %vm253_vm1, %v252_v42, 0.0 }
 0x14b   : > { %255 = vadd.xlane.f32.xlu1 %v254_v43 }
 0x1be   : > { %v256_v44 = vpop.xlane.xlu1 %255 }
 0x1bf   : > { %v257_v45 = vmul.f32 0.0078125, %v256_v44 }
 0x1c1   : > { %v258_v46 = vadd.f32 1e-06, %v257_v45 }
 0x1c3   : > { %491 = vrcp.f32 %v258_v46  ;;  %v270_v50 = vand.u32 2147483648, %v258_v46  ;;  %v268_v52 = vand.u32 2147483647, %v258_v46  ;;  %vm264_vm4 = vweird.f32 %v258_v46 }
 0x1c5   : > { %v271_v54 = vor.u32 1.1754944e-38, %v270_v50  ;;  %vm269_vm6 = vcmp.eq.f32.partialorder %v268_v52, 8.507059e+37 }
 0x1c9   : > { %v492_v47 = vpop.eup %491 }
 0x1ca   : > { %v260_v48 = vmul.f32 %v492_v47, %v258_v46  ;;  %vm265_vm3 = vweird.f32 %v492_v47 }
 0x1cb   : > { %vm266_vm5 = vmor %vm264_vm4, %vm265_vm3 }
 0x1cc   : > { %v261_v49 = vsub.f32 1.0, %v260_v48 }
 0x1ce   : > { %v262_v51 = vmul.f32 %v492_v47, %v261_v49 }
 0x1d0   : > { %v263_v53 = vadd.f32 %v492_v47, %v262_v51 }
 0x1d2   : > { %v267_v55 = vsel %vm266_vm5, %v492_v47, %v263_v53 }
 0x1d3   : > { %v272_v57 = vsel %vm269_vm6, %v271_v54, %v267_v55 }
 0x1d4   : > { %v273_v58 = vmul.f32 %v272_v57, %v252_v42 }
 0x1d6   : > { %v275_v59 = vmul.f32 %v274_v56, %v273_v58 }
 0x1d8   : > { %v276_v60 = vadd.f32 1.0, %v275_v59 }
 0x1da   : > { %v278_v61 = vperm.slane %v276_v60, 0 }
 0x1dc   : > { %v280_v63 = vmul.f32 %v278_v61, %v763_v0  ;;  %v281_v4 = vmul.f32 %v278_v61, %v765_v1  ;;  %v282_v5 = vmul.f32 %v278_v61, %v767_v2  ;;  %v283_v6 = vmul.f32 %v278_v61, %v769_v3 }
 0x1dd   : > { %v284_v8 = vmul.f32 %v278_v61, %v777_v7  ;;  %v285_v9 = vmul.f32 %v278_v61, %v781_v10  ;;  %v286_v11 = vmul.f32 %v278_v61, %v785_v13  ;;  %v287_v0 = vmul.f32 %v278_v61, %v789_v16 }
 0x1de   : > { %v292_v12 = vadd.f32 %v488_v62, %v280_v63  ;;  %v293_v14 = vadd.f32 %v488_v62, %v281_v4  ;;  %v294_v15 = vadd.f32 %v488_v62, %v282_v5  ;;  %v295_v1 = vadd.f32 %v488_v62, %v283_v6 }
 0x1df   : > { %v296_v17 = vadd.f32 %v488_v62, %v284_v8  ;;  %v297_v2 = vadd.f32 %v488_v62, %v285_v9  ;;  %v298_v3 = vadd.f32 %v488_v62, %v286_v11  ;;  %v299_v7 = vadd.f32 %v488_v62, %v287_v0 }
 0x1e0   : > { %300 = vst [vmem:[%s205_s29] sm:$0xff] %v292_v12 }
 0x1e1   : > { %301 = vst [vmem:[%s205_s29 + $0x8] sm:$0xff] %v293_v14 }
 0x1e2   : > { %302 = vst [vmem:[%s205_s29 + $0x10] sm:$0xff] %v294_v15 }
 0x1e3   : > { %303 = vst [vmem:[%s205_s29 + $0x18] sm:$0xff] %v295_v1 }
 0x1e4   : > { %304 = vst [vmem:[%s205_s29 + $0x20] sm:$0xff] %v296_v17 }
 0x1e5   : > { %305 = vst [vmem:[%s205_s29 + $0x28] sm:$0xff] %v297_v2 }
 0x1e6   : > { %306 = vst [vmem:[%s205_s29 + $0x30] sm:$0xff] %v298_v3 }
 0x1e7   : > { %307 = vst [vmem:[%s205_s29 + $0x38] sm:$0xff] %v299_v7 }
 0x1e8   : > { %580 = shalt.err (!%p577_p8)
}
 0x1e9   : > { %s630_s10 = smov 128   ;;  %s631_s26 = smov 8  }
 0x1ea   : > { %431 = dma.vmem_to_hbm [thread:$0]  (%p704_p11), %s322_s30, 1024, %s324_s4, %s309_s9, %s630_s10, %s630_s10, %s631_s26  }
 0x1eb PF: > { %s338_s6 = sand.u32 1, %s611_s12   ;;  %p851_p9 = scmp.ge.s32.totalorder %s623_s15, 2 }
 0x1ec   : > { %s339_s17 = scalar_lea.sflag [#allocation4], %s338_s6 }
 0x1ed   : > { %p442_p10 = pnand %p851_p9, %p708_p12 }
 0x1ef   : > { %p443_p1 = pneg %p442_p10 }
 0x1f1   : > { %606 = dma.done.wait (%p443_p1), %s339_s17, 1024  }
 0x1f2   : > { %608 = vsyncadd (%p443_p1), %s339_s17, 4294966272  ;;  %p17_p2 = scmp.ge.s32.totalorder %s677_s18, 4   ;;  %s852_s12 = smov %s615_s13 }
 0x1f3   : > { %s853_s13 = smov %s619_s14  ;;  %s854_s14 = smov %s689_s21 }
 0x1f4   : > { %s855_s15 = smov %s677_s18  ;;  %19 = sbr.rel (!%p17_p2) target bundleno = 6 (0x6), region = 81 }
 0x1f9   :  { %345 = vsyncpa [#allocation3], 1 }
 0x1fa   :  { %347 = vsyncpa [#allocation3 + $0x1], 1 }
 0x1fb   :  { %348 = vsyncpa [#allocation6], 1 }
 0x1fc   :  { %349 = vsyncpa [#allocation4], 1 }
 0x1fd   :  { %351 = vsyncpa [#allocation4 + $0x1], 1 }

</bundles_post_ra>
